<compile_context>
chip_gen: v7x
topology: tpu7x:2x2x1
jax: 0.10.0
libtpu: 0.0.40
codegen_flags: <defaults>
</compile_context>

<pallas_src>
import functools

import jax
import jax.numpy as jnp
from jax.experimental import pallas as pl
from jax.experimental.pallas import tpu as pltpu


def _layernorm_kernel(x_ref, g_ref, b_ref, o_ref, *, eps, features):
    """One block of rows: (block_rows, features) -> (block_rows, features)."""
    x = x_ref[...].astype(jnp.float32)

    inv_n = jnp.float32(1.0 / features)
    inv_nm1 = jnp.float32(1.0 / max(features - 1, 1))

    # Single-sweep statistics: only `x` (already resident in VMEM) stays live
    # as a block-sized operand; no `diff` / `scale` (R, F) temporaries.
    s1 = jnp.sum(x, axis=-1, keepdims=True)              # (R, 1)
    s2 = jnp.sum(x * x, axis=-1, keepdims=True)          # (R, 1)
    mean = s1 * inv_n
    # Unbiased variance (ddof=1); clamp >= 0 against cancellation rounding.
    var = jnp.maximum((s2 - s1 * mean) * inv_nm1, jnp.float32(0.0))

    # eps is added to std (not to var), exactly as in the PyTorch module.
    rinv = pl.reciprocal(jnp.sqrt(var) + jnp.float32(eps), approx=False)

    # (x - mean) and * rinv are (R,1) row-broadcasts; gamma/beta are (1,F).
    y = ((x - mean) * rinv) * g_ref[...] + b_ref[...]
    o_ref[...] = y.astype(o_ref.dtype)


def _round_up(a, m):
    return ((a + m - 1) // m) * m


def _tpu_memory_params():
    """Per-generation (VMEM-capacity-derived) block budget and VMEM limit."""
    cap = None
    try:
        info = pltpu.get_tpu_info()
        cap = int(getattr(info, "vmem_capacity_bytes", 0)) or None
    except Exception:
        cap = None
    if cap is None:
        cap = 64 * 1024 * 1024  # conservative fallback: v7x per-TC VMEM
    if cap >= 96 * 1024 * 1024:
        # v5e / v6e: 128 MiB VMEM -> 8 MiB streaming blocks.
        target_block_bytes = 8 * 1024 * 1024
    else:
        # v7x: 64 MiB per TC, but 3.2 TB/s HBM makes the ~0.35 us per-step
        # overhead proportionally larger -> still use fairly big (4 MiB) blocks.
        target_block_bytes = 4 * 1024 * 1024
    # 3/4 of physical VMEM, never above 96 MiB (v5e/v6e) / 48 MiB (v7x).
    vmem_limit_bytes = min((cap * 3) // 4, 96 * 1024 * 1024)
    return target_block_bytes, vmem_limit_bytes


def _choose_block_rows(rows, features, dtype, target_block_bytes):
    """Row tile sized on the input dtype's HBM bytes, sublane-aligned."""
    itemsize = max(jnp.dtype(dtype).itemsize, 1)
    # Sublane packing of the dtype: f32 -> 8 rows/vreg, bf16 -> 16, int8 -> 32.
    row_mult = max(8, 32 // itemsize)
    br = target_block_bytes // max(features * itemsize, 1)
    br = max(row_mult, (br // row_mult) * row_mult)
    # Keep at least ~4 grid steps when the problem is big enough so the
    # pipeline has work and v7x's two TensorCores both get blocks.
    min_steps = 4
    if rows >= min_steps * row_mult:
        cap = _round_up((rows + min_steps - 1) // min_steps, row_mult)
        br = min(br, cap)
    # Never exceed the sublane-rounded total row count.
    br = min(br, _round_up(rows, row_mult))
    return max(br, row_mult)


def layer_norm(x, a_2, b_2, eps=1e-6, block_rows=None):
    """LayerNorm over the last axis of x, matching the PyTorch module."""
    orig_shape = x.shape
    features = orig_shape[-1]
    x2d = x.reshape(-1, features)          # contiguous reshape: no HBM copy
    rows = x2d.shape[0]

    target_block_bytes, vmem_limit_bytes = _tpu_memory_params()
    if block_rows is None:
        block_rows = _choose_block_rows(rows, features, x.dtype,
                                        target_block_bytes)

    # Pre-cast gamma/beta once in the wrapper; their (1, F) blocks stay
    # resident (constant index_map) so no per-step cast happens in the kernel.
    gamma = a_2.reshape(1, features).astype(jnp.float32)
    beta = b_2.reshape(1, features).astype(jnp.float32)

    # No padding / slicing: a partial last block is masked by Pallas (reads of
    # out-of-bounds rows are row-independent garbage whose outputs are never
    # stored), so there are no extra HBM passes for non-divisible row counts.
    grid = (pl.cdiv(rows, block_rows),)

    out = pl.pallas_call(
        functools.partial(_layernorm_kernel, eps=eps, features=features),
        out_shape=jax.ShapeDtypeStruct((rows, features), x.dtype),
        grid_spec=pltpu.PrefetchScalarGridSpec(
            num_scalar_prefetch=0,
            grid=grid,
            in_specs=[
                pl.BlockSpec((block_rows, features), lambda i: (i, 0)),
                pl.BlockSpec((1, features), lambda i: (0, 0)),
                pl.BlockSpec((1, features), lambda i: (0, 0)),
            ],
            out_specs=pl.BlockSpec((block_rows, features), lambda i: (i, 0)),
        ),
        compiler_params=pltpu.CompilerParams(
            # Independent row blocks: shard the grid axis across TensorCores
            # (v7x megacore) and let the runtime pipeline HBM<->VMEM DMAs.
            dimension_semantics=("parallel",),
            vmem_limit_bytes=vmem_limit_bytes,
        ),
    )(x2d, gamma, beta)

    return out.reshape(orig_shape)


def _reference(x, a_2, b_2, eps):
    mean = jnp.mean(x, axis=-1, keepdims=True)
    std = jnp.std(x, axis=-1, keepdims=True, ddof=1)   # unbiased, like torch
    return a_2 * (x - mean) / (std + eps) + b_2


if __name__ == "__main__":
    # Small shapes implied by the module: (batch, seq, hidden)
    batch, seq, hidden = 2, 8, 32
    key0, key1 = jax.random.split(jax.random.PRNGKey(0), 2)
    x = jax.random.normal(key0, (batch, seq, hidden), dtype=jnp.float32)

    # nn.Parameter(torch.ones(features)) / torch.zeros(features)
    a_2 = jnp.ones((hidden,), dtype=jnp.float32)
    b_2 = jnp.zeros((hidden,), dtype=jnp.float32)
    eps = 1e-6

    out = layer_norm(x, a_2, b_2, eps=eps)
    out = jax.block_until_ready(out)
    ref = _reference(x, a_2, b_2, eps)
    assert jnp.allclose(out, ref, atol=1e-5, rtol=1e-5), "mismatch vs reference"

    # Second check: non-divisible row count (15 rows, block_rows=8) exercises
    # the padless masked-partial-block path introduced in this revision.
    x2 = jax.random.normal(key1, (3, 5, hidden), dtype=jnp.float32)
    out2 = jax.block_until_ready(layer_norm(x2, a_2, b_2, eps=eps, block_rows=8))
    ref2 = _reference(x2, a_2, b_2, eps)
    assert jnp.allclose(out2, ref2, atol=1e-5, rtol=1e-5), "mismatch (partial block)"

    print("KERNEL_OK")
</pallas_src>

<mosaic_0001>
module attributes {stable_mosaic.version = 11 : i64} {
  func.func @_layernorm_kernel(%arg0: i32, %arg1: memref<16x32xf32, #tpu.memory_space<vmem>>, %arg2: memref<1x32xf32, #tpu.memory_space<vmem>>, %arg3: memref<1x32xf32, #tpu.memory_space<vmem>>, %arg4: memref<16x32xf32, #tpu.memory_space<vmem>>) attributes {dimension_semantics = [#tpu.dimension_semantics<parallel>], iteration_bounds = array<i64: 1>, scalar_prefetch = 0 : i64, scratch_operands = 0 : i64, tpu.core_type = #tpu.core_type<tc>, window_params = [{transform_indices = @transform_0, window_bounds = array<i64: 16, 32>}, {pipeline_mode = #tpu.pipeline_mode<synchronous>, transform_indices = @transform_1, window_bounds = array<i64: 1, 32>}, {pipeline_mode = #tpu.pipeline_mode<synchronous>, transform_indices = @transform_2, window_bounds = array<i64: 1, 32>}, {transform_indices = @transform_3, window_bounds = array<i64: 16, 32>}]} {
    %c0 = arith.constant 0 : index
    %c0_0 = arith.constant 0 : index
    %0 = vector.load %arg1[%c0, %c0_0] : memref<16x32xf32, #tpu.memory_space<vmem>>, vector<16x32xf32>
    %cst = arith.constant dense<0.000000e+00> : vector<16xf32>
    %1 = vector.multi_reduction <add>, %0, %cst [1] : vector<16x32xf32> to vector<16xf32>
    %2 = vector.shape_cast %1 : vector<16xf32> to vector<16x1xf32>
    %3 = arith.mulf %0, %0 : vector<16x32xf32>
    %cst_1 = arith.constant dense<0.000000e+00> : vector<16xf32>
    %4 = vector.multi_reduction <add>, %3, %cst_1 [1] : vector<16x32xf32> to vector<16xf32>
    %5 = vector.shape_cast %4 : vector<16xf32> to vector<16x1xf32>
    %cst_2 = arith.constant 3.125000e-02 : f32
    %6 = vector.broadcast %cst_2 : f32 to vector<16x1xf32>
    %7 = arith.mulf %2, %6 : vector<16x1xf32>
    %8 = arith.mulf %2, %7 : vector<16x1xf32>
    %9 = arith.subf %5, %8 : vector<16x1xf32>
    %cst_3 = arith.constant 0.0322580636 : f32
    %10 = vector.broadcast %cst_3 : f32 to vector<16x1xf32>
    %11 = arith.mulf %9, %10 : vector<16x1xf32>
    %cst_4 = arith.constant 0.000000e+00 : f32
    %12 = vector.broadcast %cst_4 : f32 to vector<16x1xf32>
    %13 = arith.maximumf %11, %12 : vector<16x1xf32>
    %14 = math.sqrt %13 : vector<16x1xf32>
    %cst_5 = arith.constant 9.99999997E-7 : f32
    %15 = vector.broadcast %cst_5 : f32 to vector<16x1xf32>
    %16 = arith.addf %14, %15 : vector<16x1xf32>
    %17 = tpu.reciprocal %16 : vector<16x1xf32> -> vector<16x1xf32>
    %18 = vector.broadcast %7 : vector<16x1xf32> to vector<16x32xf32>
    %19 = arith.subf %0, %18 : vector<16x32xf32>
    %20 = vector.broadcast %17 : vector<16x1xf32> to vector<16x32xf32>
    %21 = arith.mulf %19, %20 : vector<16x32xf32>
    %c0_6 = arith.constant 0 : index
    %c0_7 = arith.constant 0 : index
    %22 = vector.load %arg2[%c0_6, %c0_7] : memref<1x32xf32, #tpu.memory_space<vmem>>, vector<1x32xf32>
    %23 = vector.broadcast %22 : vector<1x32xf32> to vector<16x32xf32>
    %24 = arith.mulf %21, %23 : vector<16x32xf32>
    %c0_8 = arith.constant 0 : index
    %c0_9 = arith.constant 0 : index
    %25 = vector.load %arg3[%c0_8, %c0_9] : memref<1x32xf32, #tpu.memory_space<vmem>>, vector<1x32xf32>
    %26 = vector.broadcast %25 : vector<1x32xf32> to vector<16x32xf32>
    %27 = arith.addf %24, %26 : vector<16x32xf32>
    %c0_10 = arith.constant 0 : index
    %c0_11 = arith.constant 0 : index
    %28 = vector.load %arg4[%c0_10, %c0_11] : memref<16x32xf32, #tpu.memory_space<vmem>>, vector<16x32xf32>
    tpu.vector_store %arg4[%c0_10, %c0_11], %27 {strides = array<i32>} : memref<16x32xf32, #tpu.memory_space<vmem>>, vector<16x32xf32>,
    return
  }
  func.func @transform_0(%arg0: i32) -> (i32, i32) {
    %c0_i32 = arith.constant 0 : i32
    %c0_i32_0 = arith.constant 0 : i32
    return %arg0, %c0_i32 : i32, i32
  }
  func.func @transform_1(%arg0: i32) -> (i32, i32) {
    %c0_i32 = arith.constant 0 : i32
    %c0_i32_0 = arith.constant 0 : i32
    %c0_i32_1 = arith.constant 0 : i32
    return %c0_i32, %c0_i32_0 : i32, i32
  }
  func.func @transform_2(%arg0: i32) -> (i32, i32) {
    %c0_i32 = arith.constant 0 : i32
    %c0_i32_0 = arith.constant 0 : i32
    %c0_i32_1 = arith.constant 0 : i32
    return %c0_i32, %c0_i32_0 : i32, i32
  }
  func.func @transform_3(%arg0: i32) -> (i32, i32) {
    %c0_i32 = arith.constant 0 : i32
    %c0_i32_0 = arith.constant 0 : i32
    return %arg0, %c0_i32 : i32, i32
  }
}

</mosaic_0001>

<bundles_post_ra>
// kernel: tpu_custom_call.1
= control target key start
LH: loop header
LB: loop body
LE: loop exit
PB: predicated region body
PF: predicated region fallthrough
CT: control target
= control target key end

     0   :  { %8 = vsyncpa [#allocation3], 0  ;;  %s243_s0 = inlined_call_operand.hbm [shape: f32[16,32], index: 0, kind: input, shape index: {}]   ;;  %s244_s1 = inlined_call_operand.vmem [shape: f32[1,32], index: 1, kind: input, shape index: {}]   ;;  %s245_s2 = inlined_call_operand.vmem [shape: f32[1,32], index: 2, kind: input, shape index: {}]   ;;  %s246_s3 = inlined_call_operand.hbm [shape: f32[16,32], index: 3, kind: output, shape index: {}]  }
   0x1   :  { %9 = vsyncpa [#allocation4], 0  ;;  %s177_s12 = smov [#allocation2]   ;;  %s129_s16 = scalar_lea.hbm %s243_s0, 256 }
   0x2   :  { %s15_s13 = sshll.u32 %s177_s12, 4  ;;  %p130_p0 = scmp.ne.s32.totalorder %s243_s0, %s129_s16  ;;  %s16_s13 = int_to_ptr.vmem [resolvable:$true] %s15_s13 }
   0x3   :  { %p133_p1 = scmp.lt.u32.totalorder %s129_s16, %s243_s0 }
   0x5   :  { %p135_p2 = pnand %p133_p1, %p130_p0 }
   0x7   :  { %138 = shalt.err (!%p135_p2)
}
   0x8   :  { %s139_s21 = scalar_lea.vmem %s16_s13, 256  ;;  %p144_p4 = scmp.lt.s32.totalorder %s16_s13, %s16_s13 }
   0x9   :  { %p140_p3 = scmp.ne.s32.totalorder %s16_s13, %s139_s21  ;;  %p145_p5 = scmp.lt.s32.totalorder %s139_s21, %s139_s21 }
   0xb   :  { %p146_p6 = por %p145_p5, %p144_p4 }
   0xd   :  { %p147_p7 = pnand %p146_p6, %p140_p3 }
   0xf   :  { %150 = shalt.err (!%p147_p7)
}
  0x10   :  { %s178_s22 = smov 128   ;;  %s179_s23 = smov 8  }
  0x11   :  { %21 = dma.hbm_to_vmem [thread:$0]  %s243_s0, 256, %s16_s13, [#allocation3], %s178_s22, %s178_s22, %s179_s23  }
  0x12   :  { %173 = dma.done.wait [#allocation3], 256  }
  0x13   :  { %174 = vsyncadd [#allocation3], 4294967040  ;;  %vm31_vm0 = vcmask 261120   ;;  %v29_v0 = vld [vmem:[#allocation2] sm:$0xff]  ;;  %v30_v1 = vld [vmem:[#allocation2 + $0x8] sm:$0xff]  ;;  %s180_s29 = smov [#allocation5]  }
  0x14   :  { %v32_v2 = vsel %vm31_vm0, %v29_v0, 0.0  ;;  %v38_v3 = vmul.f32 %v29_v0, %v29_v0  ;;  %v39_v4 = vmul.f32 %v30_v1, %v30_v1  ;;  %v35_v6 = vsel %vm31_vm0, %v30_v1, 0.0  ;;  %v115_v36 = vld [vmem:[%s244_s1] ss:$0 sm:$0xff]  ;;  %s103_s30 = sshll.u32 %s180_s29, 4  ;;  %s104_s30 = int_to_ptr.vmem [resolvable:$true] %s103_s30 }
  0x15   :  { %33 = vadd.xlane.f32.xlu0 %v32_v2  ;;  %v116_v38 = vld [vmem:[%s245_s2] ss:$0 sm:$0xff]  ;;  %s151_s1 = scalar_lea.vmem %s104_s30, 256  ;;  %p156_p9 = scmp.lt.s32.totalorder %s104_s30, %s104_s30 }
  0x16   :  { %v40_v5 = vsel %vm31_vm0, %v38_v3, 0.0  ;;  %v43_v7 = vsel %vm31_vm0, %v39_v4, 0.0  ;;  %p152_p8 = scmp.ne.s32.totalorder %s104_s30, %s151_s1  ;;  %p157_p10 = scmp.lt.s32.totalorder %s151_s1, %s151_s1 }
  0x17   :  { %41 = vadd.xlane.f32.xlu1 %v40_v5 }
  0x18   :  { %p158_p11 = por %p157_p10, %p156_p9 }
  0x19   :  { %36 = vadd.xlane.f32.xlu0 %v35_v6 }
  0x1a   :  { %p159_p12 = pnand %p158_p11, %p152_p8 }
  0x1b   :  { %44 = vadd.xlane.f32.xlu1 %v43_v7 }
  0xa2   :  { %v34_v8 = vpop.xlane.xlu0 %33 }
  0xa3   :  { %v46_v9 = vmul.f32 0.03125, %v34_v8 }
  0xa4   :  { %v42_v10 = vpop.xlane.xlu1 %41 }
  0xa5   :  { %v48_v11 = vmul.f32 %v46_v9, %v34_v8  ;;  %v74_v34 = vsub.f32 %v29_v0, %v46_v9 }
  0xa6   :  { %v37_v12 = vpop.xlane.xlu0 %36 }
  0xa7   :  { %v50_v13 = vsub.f32 %v42_v10, %v48_v11  ;;  %v47_v14 = vmul.f32 0.03125, %v37_v12 }
  0xa8   :  { %v45_v15 = vpop.xlane.xlu1 %44 }
  0xa9   :  { %v52_v16 = vmul.f32 0.032258064, %v50_v13  ;;  %v49_v17 = vmul.f32 %v47_v14, %v37_v12  ;;  %v75_v40 = vsub.f32 %v30_v1, %v47_v14 }
  0xab   :  { %v54_v18 = vmax.f32 %v52_v16, 0.0  ;;  %v51_v19 = vsub.f32 %v45_v15, %v49_v17 }
  0xad   :  { %121 = vrsqrt.f32 %v54_v18  ;;  %v53_v20 = vmul.f32 0.032258064, %v51_v19  ;;  %vm58_vm1 = vcmp.eq.f32.partialorder %v54_v18, inf  ;;  %v61_v24 = vand.u32 2147483648, %v54_v18 }
  0xae   :  { %vm60_vm2 = vcmp.eq.f32.partialorder %v54_v18, 0.0 }
  0xaf   :  { %v55_v21 = vmax.f32 %v53_v20, 0.0 }
  0xb1   :  { %123 = vrsqrt.f32 %v55_v21  ;;  %vm65_vm3 = vcmp.eq.f32.partialorder %v55_v21, inf  ;;  %v68_v30 = vand.u32 2147483648, %v55_v21  ;;  %vm67_vm4 = vcmp.eq.f32.partialorder %v55_v21, 0.0 }
  0xb7   :  { %v122_v22 = vpop.eup %121 }
  0xb8   :  { %v57_v23 = vmul.f32 %v122_v22, %v54_v18 }
  0xba   :  { %v59_v25 = vsel %vm58_vm1, %v54_v18, %v57_v23 }
  0xbb   :  { %v62_v26 = vsel %vm60_vm2, %v61_v24, %v59_v25  ;;  %v124_v27 = vpop.eup %123 }
  0xbc   :  { %v70_v28 = vadd.f32 1e-06, %v62_v26  ;;  %v64_v29 = vmul.f32 %v124_v27, %v55_v21 }
  0xbe   :  { %125 = vrcp.f32 %v70_v28  ;;  %v66_v31 = vsel %vm65_vm3, %v55_v21, %v64_v29 }
  0xbf   :  { %v69_v32 = vsel %vm67_vm4, %v68_v30, %v66_v31 }
  0xc0   :  { %v71_v33 = vadd.f32 1e-06, %v69_v32 }
  0xc2   :  { %127 = vrcp.f32 %v71_v33 }
  0xc8   :  { %v126_v35 = vpop.eup %125 }
  0xc9   :  { %v76_v37 = vmul.f32 %v126_v35, %v74_v34 }
  0xcb   :  { %v85_v39 = vmul.f32 %v115_v36, %v76_v37 }
  0xcc   :  { %v128_v41 = vpop.eup %127 }
  0xcd   :  { %v94_v42 = vadd.f32 %v116_v38, %v85_v39  ;;  %v77_v43 = vmul.f32 %v128_v41, %v75_v40 }
  0xcf   :  { %96 = vst.msk [vmem:[#allocation5] sm:$0xff] %vm31_vm0, %v94_v42  ;;  %v86_v44 = vmul.f32 %v115_v36, %v77_v43 }
  0xd1   :  { %v95_v45 = vadd.f32 %v116_v38, %v86_v44 }
  0xd3   :  { %97 = vst.msk [vmem:[#allocation5 + $0x8] sm:$0xff] %vm31_vm0, %v95_v45 }
  0xd4   :  { %162 = shalt.err (!%p159_p12)
}
  0xd5   :  { %s163_s5 = scalar_lea.hbm %s246_s3, 256 }
  0xd6   :  { %p164_p13 = scmp.ne.s32.totalorder %s246_s3, %s163_s5  ;;  %p167_p0 = scmp.lt.u32.totalorder %s163_s5, %s246_s3 }
  0xd8   :  { %p169_p1 = pnand %p167_p0, %p164_p13 }
  0xda   :  { %172 = shalt.err (!%p169_p1)
}
  0xdb   :  { %109 = dma.vmem_to_hbm [thread:$0]  %s104_s30, 256, %s246_s3, [#allocation4], %s178_s22, %s178_s22, %s179_s23  }
  0xdc   :  { %175 = dma.done.wait [#allocation4], 256  }
  0xdd   :  { %176 = vsyncadd [#allocation4], 4294967040 }
  0xde   :  { %113 = vsyncpa [#allocation3], 1 }
  0xdf   :  { %114 = vsyncpa [#allocation4], 1 }

</bundles_post_ra>
